<compile_context>
chip_gen: v6e
topology: v6e:2x2x1
jax: 0.10.0
libtpu: 0.0.40
codegen_flags: <defaults>
</compile_context>

<pallas_src>
import functools

import jax
import jax.numpy as jnp
from jax.experimental import pallas as pl
from jax.experimental.pallas import tpu as pltpu


# ----------------------------- Pallas kernels --------------------------------
def _stft_stream_kernel(a_ref, b_ref, w_ref, out_ref, *, r, f_pad):
    """Streaming windowed-DFT magnitude for one (bc, frame-tile) grid step.

    a_ref : (1, TILE_M, hop)   chunk tile  (chunks m*TILE_M .. m*TILE_M+TILE_M)
    b_ref : (1, 8, hop)        halo chunks (next 8 chunks, covers frame overlap)
    w_ref : (S, 2*F_pad)       window-folded DFT matrix [win*cos | -win*sin]
    out_ref: (1, TILE_M, F_pad) |STFT| (lane-dense, padded bins sliced outside)
    """
    a = a_ref[0]                                   # (TILE_M, hop)
    b = b_ref[0]                                   # (8, hop)
    tile_m = a.shape[0]
    cat = jnp.concatenate([a, b], axis=0)          # (TILE_M + 8, hop)
    # frame i, segment k (k*hop..(k+1)*hop) == audio chunk (i + k)
    frames = jnp.concatenate(
        [cat[k:k + tile_m, :] for k in range(r)], axis=1)          # (TILE_M, S)
    z = jnp.dot(frames, w_ref[...],
                preferred_element_type=jnp.float32)                # MXU, N=2*F_pad
    re = z[:, :f_pad]
    im = z[:, f_pad:]
    out_ref[0] = jnp.sqrt(re * re + im * im + 1e-12)               # eps: safe grad


def _stft_preframed_kernel(frames_ref, w_ref, out_ref, *, f_pad):
    """Fallback kernel (frames already materialized): one fused dot + magnitude."""
    z = jnp.dot(frames_ref[0], w_ref[...], preferred_element_type=jnp.float32)
    re = z[:, :f_pad]
    im = z[:, f_pad:]
    out_ref[0] = jnp.sqrt(re * re + im * im + 1e-12)


# --------------------------- trace-time constants -----------------------------
def _round_up(x, m):
    return ((x + m - 1) // m) * m


def _hann(n):
    k = jnp.arange(n, dtype=jnp.float32)
    return 0.5 - 0.5 * jnp.cos(2.0 * jnp.pi * k / n)


def _windowed_dft_matrix(n_fft, f_pad):
    """W = [win*cos | -win*sin], zero-padded to (S, 2*f_pad).  (x*win)@D == x@(diag(win)D)."""
    n_bins = n_fft // 2 + 1
    n = jnp.arange(n_fft, dtype=jnp.float32)[:, None]
    k = jnp.arange(n_bins, dtype=jnp.float32)[None, :]
    ang = 2.0 * jnp.pi * n * k / n_fft
    win = _hann(n_fft)[:, None]
    wr = win * jnp.cos(ang)
    wi = win * (-jnp.sin(ang))
    pad = f_pad - n_bins
    wr = jnp.pad(wr, ((0, 0), (0, pad)))
    wi = jnp.pad(wi, ((0, 0), (0, pad)))
    return jnp.concatenate([wr, wi], axis=1)       # (S, 2*f_pad)


# ------------------------------ per-scale STFT --------------------------------
_MAX_TILE_M = 512          # frame rows per grid step (v5e wants >=256; VMEM-safe on v7x)
_HALO_CHUNKS = 8           # halo block (covers frame overlap when S/hop - 1 <= 8)


def _stft_scale_stream(y_flat, s, hop, n_frames):
    """Streaming path: reads overlapping windows directly from the audio (no 4x gather)."""
    bc, t = y_flat.shape
    r = s // hop
    n_bins = s // 2 + 1
    f_pad = _round_up(n_bins, 128)
    tile_m = min(_MAX_TILE_M, _round_up(n_frames, 8))
    n_tiles = pl.cdiv(n_frames, tile_m)

    n_chunks_pad = n_tiles * tile_m + _HALO_CHUNKS
    t_pad = n_chunks_pad * hop
    if t_pad > t:
        y_pad = jnp.pad(y_flat, ((0, 0), (0, t_pad - t)))
    else:
        y_pad = y_flat[:, :t_pad]
    chunks = y_pad.reshape(bc, n_chunks_pad, hop)                  # free reshape

    w = _windowed_dft_matrix(s, f_pad)
    kernel = functools.partial(_stft_stream_kernel, r=r, f_pad=f_pad)
    blocks_per_tile = tile_m // _HALO_CHUNKS

    out = pl.pallas_call(
        kernel,
        out_shape=jax.ShapeDtypeStruct((bc, n_tiles * tile_m, f_pad), jnp.float32),
        grid_spec=pltpu.PrefetchScalarGridSpec(
            num_scalar_prefetch=0,
            grid=(bc, n_tiles),
            in_specs=[
                # chunk tile for this frame tile
                pl.BlockSpec((1, tile_m, hop), lambda b, m: (b, m, 0)),
                # halo: first 8 chunks of the NEXT tile (same array, small block)
                pl.BlockSpec((1, _HALO_CHUNKS, hop),
                             lambda b, m: (b, (m + 1) * blocks_per_tile, 0)),
                # window-folded DFT matrix stays resident
                pl.BlockSpec((s, 2 * f_pad), lambda b, m: (0, 0)),
            ],
            out_specs=pl.BlockSpec((1, tile_m, f_pad), lambda b, m: (b, m, 0)),
        ),
        compiler_params=pltpu.CompilerParams(
            dimension_semantics=("parallel", "parallel"),
        ),
    )(chunks, chunks, w)
    return out[:, :n_frames, :n_bins]


def _stft_scale_preframed(y_flat, s, hop, n_frames):
    """Fallback path (hop does not evenly divide S): gather frames, still tiled/fused."""
    bc, t = y_flat.shape
    n_bins = s // 2 + 1
    f_pad = _round_up(n_bins, 128)
    tile_m = min(_MAX_TILE_M, _round_up(n_frames, 8))
    n_tiles = pl.cdiv(n_frames, tile_m)

    idx = jnp.arange(n_frames)[:, None] * hop + jnp.arange(s)[None, :]
    frames = y_flat[:, idx]                                        # (bc, n_frames, s)
    frames = jnp.pad(frames, ((0, 0), (0, n_tiles * tile_m - n_frames), (0, 0)))

    w = _windowed_dft_matrix(s, f_pad)
    kernel = functools.partial(_stft_preframed_kernel, f_pad=f_pad)

    out = pl.pallas_call(
        kernel,
        out_shape=jax.ShapeDtypeStruct((bc, n_tiles * tile_m, f_pad), jnp.float32),
        grid_spec=pltpu.PrefetchScalarGridSpec(
            num_scalar_prefetch=0,
            grid=(bc, n_tiles),
            in_specs=[
                pl.BlockSpec((1, tile_m, s), lambda b, m: (b, m, 0)),
                pl.BlockSpec((s, 2 * f_pad), lambda b, m: (0, 0)),
            ],
            out_specs=pl.BlockSpec((1, tile_m, f_pad), lambda b, m: (b, m, 0)),
        ),
        compiler_params=pltpu.CompilerParams(
            dimension_semantics=("parallel", "parallel"),
        ),
    )(frames, w)
    return out[:, :n_frames, :n_bins]


# TODO(synk): optional bf16 cast of frames/W (v6e/v7x MXU fast path) left out to
# stay within the f32 1e-3 correctness tolerance; flip dtypes here if acceptable.


# --------------------------- MultiscaleFFT glue ------------------------------
def multiscale_fft(y, scales, overlap):
    """y: (B, C, T) float32 -> list of (B, C, n_frames, n_fft//2+1) magnitudes."""
    b, c, t = y.shape
    y_flat = y.reshape(b * c, t).astype(jnp.float32)
    outs = []
    for s in scales:
        hop = int(s * (1.0 - overlap))
        n_frames = (t - s) // hop + 1
        if s % hop == 0 and (s // hop) - 1 <= _HALO_CHUNKS:
            mag = _stft_scale_stream(y_flat, s, hop, n_frames)
        else:
            mag = _stft_scale_preframed(y_flat, s, hop, n_frames)
        outs.append(mag.reshape(b, c, n_frames, s // 2 + 1))
    return outs


# ------------------------------- BaseModel -----------------------------------
class BaseModelPallas:
    """Pallas port of BaseModel: forward() = multi-scale STFT of self.y.

    encode/decode/synth/optimize_parameters are abstract in the PyTorch source,
    so they are not implemented here.
    """

    def __init__(self, config):
        self.scales = tuple(config["fft_scales"])
        self.overlap = float(config["overlap"])
        self.scale = config["fft_scales"][0]
        # one compiled program: constants, padding, both per-scale pallas_calls fuse
        self._mfft = jax.jit(
            functools.partial(multiscale_fft, scales=self.scales, overlap=self.overlap))

    def set_input(self, y, y_orig):
        self.y = y
        self.y_orig = y_orig

    def forward(self):
        self.y_stfts = self._mfft(self.y)
        # TODO(synk): encode / decode / synth are @abstractmethod in BaseModel
        # (no concrete semantics to translate); forward stops after the STFTs.
        return self.y_stfts


# --------------------------------- main ---------------------------------------
if __name__ == "__main__":
    config = {"fft_scales": [256, 128], "overlap": 0.75}

    key = jax.random.PRNGKey(0)
    k1, k2 = jax.random.split(key)
    B, C, T = 2, 2, 1024                      # batch x binaural(2) x audio_samples
    y = jax.random.normal(k1, (B, C, T), dtype=jnp.float32)
    y_orig = jax.random.normal(k2, (B, C, T), dtype=jnp.float32)

    model = BaseModelPallas(config)
    model.set_input(y, y_orig)
    stfts = model.forward()
    stfts = jax.block_until_ready(stfts)

    # sanity: compare against a plain-JAX reference of the same windowed DFT
    for s, mag in zip(config["fft_scales"], stfts):
        hop = int(s * (1.0 - config["overlap"]))
        n_frames = (T - s) // hop + 1
        idx = jnp.arange(n_frames)[:, None] * hop + jnp.arange(s)[None, :]
        frames = y.reshape(B * C, T)[:, idx].reshape(-1, s)
        win = _hann(s)
        n = jnp.arange(s, dtype=jnp.float32)[:, None]
        kf = jnp.arange(s // 2 + 1, dtype=jnp.float32)[None, :]
        ang = 2.0 * jnp.pi * n * kf / s
        xw = frames * win[None, :]
        ref = jnp.sqrt((xw @ jnp.cos(ang)) ** 2 + (xw @ (-jnp.sin(ang))) ** 2)
        ref = ref.reshape(B, C, n_frames, s // 2 + 1)
        assert mag.shape == ref.shape, "shape mismatch vs reference"
        assert jnp.allclose(mag, ref, atol=2e-3, rtol=2e-3), "mismatch vs reference"

    print("KERNEL_OK")
</pallas_src>

<mosaic_0001>
module attributes {stable_mosaic.version = 11 : i64} {
  func.func @_stft_stream_kernel(%arg0: i32, %arg1: i32, %arg2: memref<1x16x64xf32, #tpu.memory_space<vmem>>, %arg3: memref<1x8x64xf32, #tpu.memory_space<vmem>>, %arg4: memref<256x512xf32, #tpu.memory_space<vmem>>, %arg5: memref<1x16x256xf32, #tpu.memory_space<vmem>>) attributes {dimension_semantics = [#tpu.dimension_semantics<parallel>, #tpu.dimension_semantics<parallel>], iteration_bounds = array<i64: 4, 1>, scalar_prefetch = 0 : i64, scratch_operands = 0 : i64, tpu.core_type = #tpu.core_type<tc>, window_params = [{transform_indices = @transform_0, window_bounds = array<i64: 1, 16, 64>}, {transform_indices = @transform_1, window_bounds = array<i64: 1, 8, 64>}, {pipeline_mode = #tpu.pipeline_mode<synchronous>, transform_indices = @transform_2, window_bounds = array<i64: 256, 512>}, {transform_indices = @transform_3, window_bounds = array<i64: 1, 16, 256>}]} {
    %c0 = arith.constant 0 : index
    %c0_0 = arith.constant 0 : index
    %c0_1 = arith.constant 0 : index
    %0 = vector.load %arg2[%c0, %c0_0, %c0_1] : memref<1x16x64xf32, #tpu.memory_space<vmem>>, vector<1x16x64xf32>
    %1 = vector.shape_cast %0 : vector<1x16x64xf32> to vector<16x64xf32>
    %c0_2 = arith.constant 0 : index
    %c0_3 = arith.constant 0 : index
    %c0_4 = arith.constant 0 : index
    %2 = vector.load %arg3[%c0_2, %c0_3, %c0_4] : memref<1x8x64xf32, #tpu.memory_space<vmem>>, vector<1x8x64xf32>
    %3 = vector.shape_cast %2 : vector<1x8x64xf32> to vector<8x64xf32>
    %4 = tpu.concatenate %1, %3 in 0 : vector<16x64xf32>, vector<8x64xf32> -> vector<24x64xf32>
    %5 = vector.extract_strided_slice %4 {offsets = [0, 0], sizes = [16, 64], strides = [1, 1]} : vector<24x64xf32> to vector<16x64xf32>
    %6 = vector.extract_strided_slice %4 {offsets = [1, 0], sizes = [16, 64], strides = [1, 1]} : vector<24x64xf32> to vector<16x64xf32>
    %7 = vector.extract_strided_slice %4 {offsets = [2, 0], sizes = [16, 64], strides = [1, 1]} : vector<24x64xf32> to vector<16x64xf32>
    %8 = vector.extract_strided_slice %4 {offsets = [3, 0], sizes = [16, 64], strides = [1, 1]} : vector<24x64xf32> to vector<16x64xf32>
    %9 = tpu.concatenate %5, %6, %7, %8 in 1 : vector<16x64xf32>, vector<16x64xf32>, vector<16x64xf32>, vector<16x64xf32> -> vector<16x256xf32>
    %c0_5 = arith.constant 0 : index
    %c0_6 = arith.constant 0 : index
    %10 = vector.load %arg4[%c0_5, %c0_6] : memref<256x512xf32, #tpu.memory_space<vmem>>, vector<256x512xf32>
    %cst = arith.constant dense<0.000000e+00> : vector<16x512xf32>
    %11 = tpu.matmul %9, %10, %cst {dimension_numbers = #tpu.dot_dimension_numbers<[1], [0], [0], [1], [0, 0, 1, 1], [], []>} : vector<16x256xf32>, vector<256x512xf32>, vector<16x512xf32> -> vector<16x512xf32>
    %12 = vector.extract_strided_slice %11 {offsets = [0, 0], sizes = [16, 256], strides = [1, 1]} : vector<16x512xf32> to vector<16x256xf32>
    %13 = vector.extract_strided_slice %11 {offsets = [0, 256], sizes = [16, 256], strides = [1, 1]} : vector<16x512xf32> to vector<16x256xf32>
    %14 = arith.mulf %12, %12 : vector<16x256xf32>
    %15 = arith.mulf %13, %13 : vector<16x256xf32>
    %16 = arith.addf %14, %15 : vector<16x256xf32>
    %cst_7 = arith.constant 9.99999996E-13 : f32
    %17 = vector.broadcast %cst_7 : f32 to vector<16x256xf32>
    %18 = arith.addf %16, %17 : vector<16x256xf32>
    %19 = math.sqrt %18 : vector<16x256xf32>
    %c0_8 = arith.constant 0 : index
    %c0_9 = arith.constant 0 : index
    %c0_10 = arith.constant 0 : index
    %20 = vector.load %arg5[%c0_8, %c0_9, %c0_10] : memref<1x16x256xf32, #tpu.memory_space<vmem>>, vector<1x16x256xf32>
    %21 = vector.shape_cast %20 : vector<1x16x256xf32> to vector<16x256xf32>
    %22 = vector.shape_cast %19 : vector<16x256xf32> to vector<1x16x256xf32>
    tpu.vector_store %arg5[%c0_8, %c0_9, %c0_10], %22 {strides = array<i32>} : memref<1x16x256xf32, #tpu.memory_space<vmem>>, vector<1x16x256xf32>,
    return
  }
  func.func @transform_0(%arg0: i32, %arg1: i32) -> (i32, i32, i32) {
    %c0_i32 = arith.constant 0 : i32
    %c0_i32_0 = arith.constant 0 : i32
    return %arg0, %arg1, %c0_i32 : i32, i32, i32
  }
  func.func @transform_1(%arg0: i32, %arg1: i32) -> (i32, i32, i32) {
    %c1_i32 = arith.constant 1 : i32
    %0 = arith.addi %arg1, %c1_i32 : i32
    %c2_i32 = arith.constant 2 : i32
    %1 = arith.muli %0, %c2_i32 : i32
    %c0_i32 = arith.constant 0 : i32
    %c0_i32_0 = arith.constant 0 : i32
    return %arg0, %1, %c0_i32 : i32, i32, i32
  }
  func.func @transform_2(%arg0: i32, %arg1: i32) -> (i32, i32) {
    %c0_i32 = arith.constant 0 : i32
    %c0_i32_0 = arith.constant 0 : i32
    %c0_i32_1 = arith.constant 0 : i32
    return %c0_i32, %c0_i32_0 : i32, i32
  }
  func.func @transform_3(%arg0: i32, %arg1: i32) -> (i32, i32, i32) {
    %c0_i32 = arith.constant 0 : i32
    %c0_i32_0 = arith.constant 0 : i32
    return %arg0, %arg1, %c0_i32 : i32, i32, i32
  }
}

module attributes {stable_mosaic.version = 11 : i64} {
  func.func @_stft_stream_kernel(%arg0: i32, %arg1: i32, %arg2: memref<1x32x32xf32, #tpu.memory_space<vmem>>, %arg3: memref<1x8x32xf32, #tpu.memory_space<vmem>>, %arg4: memref<128x256xf32, #tpu.memory_space<vmem>>, %arg5: memref<1x32x128xf32, #tpu.memory_space<vmem>>) attributes {dimension_semantics = [#tpu.dimension_semantics<parallel>, #tpu.dimension_semantics<parallel>], iteration_bounds = array<i64: 4, 1>, scalar_prefetch = 0 : i64, scratch_operands = 0 : i64, tpu.core_type = #tpu.core_type<tc>, window_params = [{transform_indices = @transform_0, window_bounds = array<i64: 1, 32, 32>}, {transform_indices = @transform_1, window_bounds = array<i64: 1, 8, 32>}, {pipeline_mode = #tpu.pipeline_mode<synchronous>, transform_indices = @transform_2, window_bounds = array<i64: 128, 256>}, {transform_indices = @transform_3, window_bounds = array<i64: 1, 32, 128>}]} {
    %c0 = arith.constant 0 : index
    %c0_0 = arith.constant 0 : index
    %c0_1 = arith.constant 0 : index
    %0 = vector.load %arg2[%c0, %c0_0, %c0_1] : memref<1x32x32xf32, #tpu.memory_space<vmem>>, vector<1x32x32xf32>
    %1 = vector.shape_cast %0 : vector<1x32x32xf32> to vector<32x32xf32>
    %c0_2 = arith.constant 0 : index
    %c0_3 = arith.constant 0 : index
    %c0_4 = arith.constant 0 : index
    %2 = vector.load %arg3[%c0_2, %c0_3, %c0_4] : memref<1x8x32xf32, #tpu.memory_space<vmem>>, vector<1x8x32xf32>
    %3 = vector.shape_cast %2 : vector<1x8x32xf32> to vector<8x32xf32>
    %4 = tpu.concatenate %1, %3 in 0 : vector<32x32xf32>, vector<8x32xf32> -> vector<40x32xf32>
    %5 = vector.extract_strided_slice %4 {offsets = [0, 0], sizes = [32, 32], strides = [1, 1]} : vector<40x32xf32> to vector<32x32xf32>
    %6 = vector.extract_strided_slice %4 {offsets = [1, 0], sizes = [32, 32], strides = [1, 1]} : vector<40x32xf32> to vector<32x32xf32>
    %7 = vector.extract_strided_slice %4 {offsets = [2, 0], sizes = [32, 32], strides = [1, 1]} : vector<40x32xf32> to vector<32x32xf32>
    %8 = vector.extract_strided_slice %4 {offsets = [3, 0], sizes = [32, 32], strides = [1, 1]} : vector<40x32xf32> to vector<32x32xf32>
    %9 = tpu.concatenate %5, %6, %7, %8 in 1 : vector<32x32xf32>, vector<32x32xf32>, vector<32x32xf32>, vector<32x32xf32> -> vector<32x128xf32>
    %c0_5 = arith.constant 0 : index
    %c0_6 = arith.constant 0 : index
    %10 = vector.load %arg4[%c0_5, %c0_6] : memref<128x256xf32, #tpu.memory_space<vmem>>, vector<128x256xf32>
    %cst = arith.constant dense<0.000000e+00> : vector<32x256xf32>
    %11 = tpu.matmul %9, %10, %cst {dimension_numbers = #tpu.dot_dimension_numbers<[1], [0], [0], [1], [0, 0, 1, 1], [], []>} : vector<32x128xf32>, vector<128x256xf32>, vector<32x256xf32> -> vector<32x256xf32>
    %12 = vector.extract_strided_slice %11 {offsets = [0, 0], sizes = [32, 128], strides = [1, 1]} : vector<32x256xf32> to vector<32x128xf32>
    %13 = vector.extract_strided_slice %11 {offsets = [0, 128], sizes = [32, 128], strides = [1, 1]} : vector<32x256xf32> to vector<32x128xf32>
    %14 = arith.mulf %12, %12 : vector<32x128xf32>
    %15 = arith.mulf %13, %13 : vector<32x128xf32>
    %16 = arith.addf %14, %15 : vector<32x128xf32>
    %cst_7 = arith.constant 9.99999996E-13 : f32
    %17 = vector.broadcast %cst_7 : f32 to vector<32x128xf32>
    %18 = arith.addf %16, %17 : vector<32x128xf32>
    %19 = math.sqrt %18 : vector<32x128xf32>
    %c0_8 = arith.constant 0 : index
    %c0_9 = arith.constant 0 : index
    %c0_10 = arith.constant 0 : index
    %20 = vector.load %arg5[%c0_8, %c0_9, %c0_10] : memref<1x32x128xf32, #tpu.memory_space<vmem>>, vector<1x32x128xf32>
    %21 = vector.shape_cast %20 : vector<1x32x128xf32> to vector<32x128xf32>
    %22 = vector.shape_cast %19 : vector<32x128xf32> to vector<1x32x128xf32>
    tpu.vector_store %arg5[%c0_8, %c0_9, %c0_10], %22 {strides = array<i32>} : memref<1x32x128xf32, #tpu.memory_space<vmem>>, vector<1x32x128xf32>,
    return
  }
  func.func @transform_0(%arg0: i32, %arg1: i32) -> (i32, i32, i32) {
    %c0_i32 = arith.constant 0 : i32
    %c0_i32_0 = arith.constant 0 : i32
    return %arg0, %arg1, %c0_i32 : i32, i32, i32
  }
  func.func @transform_1(%arg0: i32, %arg1: i32) -> (i32, i32, i32) {
    %c1_i32 = arith.constant 1 : i32
    %0 = arith.addi %arg1, %c1_i32 : i32
    %c4_i32 = arith.constant 4 : i32
    %1 = arith.muli %0, %c4_i32 : i32
    %c0_i32 = arith.constant 0 : i32
    %c0_i32_0 = arith.constant 0 : i32
    return %arg0, %1, %c0_i32 : i32, i32, i32
  }
  func.func @transform_2(%arg0: i32, %arg1: i32) -> (i32, i32) {
    %c0_i32 = arith.constant 0 : i32
    %c0_i32_0 = arith.constant 0 : i32
    %c0_i32_1 = arith.constant 0 : i32
    return %c0_i32, %c0_i32_0 : i32, i32
  }
  func.func @transform_3(%arg0: i32, %arg1: i32) -> (i32, i32, i32) {
    %c0_i32 = arith.constant 0 : i32
    %c0_i32_0 = arith.constant 0 : i32
    return %arg0, %arg1, %c0_i32 : i32, i32, i32
  }
}

</mosaic_0001>

<bundles_post_ra>
// kernel: multiscale_fft.2
= control target key start
LH: loop header
LB: loop body
LE: loop exit
PB: predicated region body
PF: predicated region fallthrough
CT: control target
= control target key end

     0   :  { %s866_s12 = smov 0   ;;  %s868_s13 = smov 0   ;;  %s1311_s0 = inlined_call_operand.vmem [shape: f32[4,24,64], index: 0, kind: input, shape index: {}, may-alias: {0,1}]   ;;  %s1312_s1 = inlined_call_operand.vmem [shape: f32[4,24,64], index: 1, kind: input, shape index: {}, may-alias: {0,1}]   ;;  %s1313_s2 = inlined_call_operand.vmem [shape: f32[256,512], index: 2, kind: input, shape index: {}]   ;;  %s1314_s3 = inlined_call_operand.vmem [shape: f32[4,16,256], index: 3, kind: output, shape index: {}]  }
   0x1   :  { %s870_s14 = smov 0  }
   0x2 LB: > { %s25_s15 = sadd.s32 1, %s839_s13  ;;  %p765_p0 = scmp.ge.s32.totalorder %s843_s14, 1  ;;  %s843_s14 = sphi %s870_s14, %s13_s14   ;;  %s839_s13 = sphi %s868_s13, %s1316_s13   ;;  %s835_s12 = sphi %s866_s12, %s1315_s12  }
   0x3   : > { %p27_p1 = scmp.ge.s32.totalorder %s25_s15, 4  ;;  %p189_p2 = scmp.lt.s32.totalorder %s843_s14, 5 }
   0x5   : > { %s1318_s15 = smov (%p27_p1, %s25_s15), 0  ;;  %p190_p3 = pnand %p765_p0, %p189_p2 }
   0x6   : > { %p241_p4 = scmp.lt.s32.totalorder (!%p190_p3), %s835_s12, 3  ;;  %s845_s9 = smov (!%p190_p3), 64  }
   0x7   : > { %193 = sbr.rel (%p190_p3) target bundleno = 369 (0x171), region = 32 }
   0xc   : > { %v381_v0 = vld [vmem:[%s1313_s2 + $0x1e8] sm:$0xff]  ;;  %v383_v1 = vld [vmem:[%s1313_s2 + $0x1f8] sm:$0xff]  ;;  %v380_v2 = vld [vmem:[%s1313_s2 + $0x1e0] sm:$0xff]  ;;  %s1320_s12 = smov (!%p241_p4, %s835_s12), 3  ;;  %vm283_vm0 = vcmask 1046528   ;;  %vm303_vm1 = vcmask 1044480  }
   0xd   : > { %448 = vmatprep.subr.mxu0 %v381_v0  ;;  %525 = vmatprep.subr.mxu1 %v383_v1  ;;  %v382_v3 = vld [vmem:[%s1313_s2 + $0x1f0] sm:$0xff]  ;;  %v377_v4 = vld [vmem:[%s1313_s2 + $0x1c8] sm:$0xff]  ;;  %v379_v5 = vld [vmem:[%s1313_s2 + $0x1d8] sm:$0xff]  ;;  %s775_s11 = smul.u32 24, %s1320_s12  ;;  %vm295_vm2 = vcmask 1045504   ;;  %vm315_vm3 = vcmask 523264  }
   0xe   : > { %449 = vmatpush1.msra.mxu0 %v380_v2  ;;  %526 = vmatpush1.msra.mxu1 %v382_v3  ;;  %v376_v6 = vld [vmem:[%s1313_s2 + $0x1c0] sm:$0xff]  ;;  %v378_v7 = vld [vmem:[%s1313_s2 + $0x1d0] sm:$0xff]  ;;  %v373_v8 = vld [vmem:[%s1313_s2 + $0x1a8] sm:$0xff]  ;;  %s774_s28 = sshll.u32 %s1320_s12, 5 }
   0xf   : > { %450 = vmatprep.subr.mxu0 %v377_v4  ;;  %527 = vmatprep.subr.mxu1 %v379_v5  ;;  %v375_v9 = vld [vmem:[%s1313_s2 + $0x1b8] sm:$0xff]  ;;  %v372_v10 = vld [vmem:[%s1313_s2 + $0x1a0] sm:$0xff]  ;;  %v374_v11 = vld [vmem:[%s1313_s2 + $0x1b0] sm:$0xff]  ;;  %s248_s30 = scalar_lea.vmem %s1311_s0, %s775_s11  ;;  %s773_s4 = sadd.s32 16, %s775_s11 }
  0x10   : > { %451 = vmatpush1.msra.mxu0 %v376_v6  ;;  %528 = vmatpush1.msra.mxu1 %v378_v7  ;;  %v369_v12 = vld [vmem:[%s1313_s2 + $0x188] sm:$0xff]  ;;  %v371_v13 = vld [vmem:[%s1313_s2 + $0x198] sm:$0xff]  ;;  %v368_v14 = vld [vmem:[%s1313_s2 + $0x180] sm:$0xff]  ;;  %s263_s17 = scalar_lea.vmem %s1312_s1, %s773_s4  ;;  %s275_s4 = scalar_lea.vmem %s1314_s3, %s774_s28 }
  0x11   : > { %452 = vmatprep.subr.mxu0 %v373_v8  ;;  %529 = vmatprep.subr.mxu1 %v375_v9  ;;  %v370_v15 = vld [vmem:[%s1313_s2 + $0x190] sm:$0xff]  ;;  %v365_v16 = vld [vmem:[%s1313_s2 + $0x168] sm:$0xff]  ;;  %v367_v17 = vld [vmem:[%s1313_s2 + $0x178] sm:$0xff] }
  0x12   : > { %453 = vmatpush1.msra.mxu0 %v372_v10  ;;  %530 = vmatpush1.msra.mxu1 %v374_v11  ;;  %v364_v18 = vld [vmem:[%s1313_s2 + $0x160] sm:$0xff]  ;;  %v366_v19 = vld [vmem:[%s1313_s2 + $0x170] sm:$0xff]  ;;  %v952_v21 = vld [vmem:[%s248_s30 + $0x8] sm:$0xff] }
  0x13   : > { %v950_v20 = vld [vmem:[%s248_s30] sm:$0xff]  ;;  %454 = vmatprep.subr.mxu0 %v369_v12  ;;  %531 = vmatprep.subr.mxu1 %v371_v13  ;;  %v361_v22 = vld [vmem:[%s1313_s2 + $0x148] sm:$0xff]  ;;  %v285_v24 = vrot.slane %v952_v21, 1  ;;  %v305_v26 = vrot.slane %v952_v21, 3  ;;  %v363_v28 = vld [vmem:[%s1313_s2 + $0x158] sm:$0xff] }
  0x14   : > { %v284_v23 = vrot.slane %v950_v20, 1  ;;  %v304_v25 = vrot.slane %v950_v20, 3  ;;  %v964_v27 = vld [vmem:[%s263_s17] sm:$0xff]  ;;  %455 = vmatpush1.msra.mxu0 %v368_v14  ;;  %532 = vmatpush1.msra.mxu1 %v370_v15  ;;  %v362_v32 = vld [vmem:[%s1313_s2 + $0x150] sm:$0xff]  ;;  %v357_v35 = vld [vmem:[%s1313_s2 + $0x128] sm:$0xff] }
  0x15   : > { %v287_v29 = vrot.slane %v964_v27, 1  ;;  %v307_v30 = vrot.slane %v964_v27, 3  ;;  %456 = vmatprep.subr.mxu0 %v365_v16  ;;  %533 = vmatprep.subr.mxu1 %v367_v17  ;;  %v360_v31 = vld [vmem:[%s1313_s2 + $0x140] sm:$0xff]  ;;  %v359_v39 = vld [vmem:[%s1313_s2 + $0x138] sm:$0xff]  ;;  %v358_v41 = vld [vmem:[%s1313_s2 + $0x130] sm:$0xff] }
  0x16   : > { %v286_v33 = vsel %vm283_vm0, %v284_v23, %v285_v24  ;;  %v306_v34 = vsel %vm303_vm1, %v304_v25, %v305_v26  ;;  %457 = vmatpush1.msra.mxu0 %v364_v18  ;;  %534 = vmatpush1.msra.mxu1 %v366_v19  ;;  %v356_v40 = vld [vmem:[%s1313_s2 + $0x120] sm:$0xff]  ;;  %v353_v42 = vld [vmem:[%s1313_s2 + $0x108] sm:$0xff]  ;;  %v355_v44 = vld [vmem:[%s1313_s2 + $0x118] sm:$0xff] }
  0x17   : > { %v803_v36 = vpack.i.bf16 %v286_v33, %v306_v34  ;;  %v288_v37 = vsel %vm283_vm0, %v285_v24, %v287_v29  ;;  %v308_v38 = vsel %vm303_vm1, %v305_v26, %v307_v30  ;;  %458 = vmatprep.subr.mxu0 %v361_v22  ;;  %535 = vmatprep.subr.mxu1 %v363_v28  ;;  %v352_v45 = vld [vmem:[%s1313_s2 + $0x100] sm:$0xff]  ;;  %v354_v46 = vld [vmem:[%s1313_s2 + $0x110] sm:$0xff]  ;;  %v349_v47 = vld [vmem:[%s1313_s2 + $0xe8] sm:$0xff] }
  0x18   : > { %459 = vmatpush1.msra.mxu0 %v360_v31  ;;  %536 = vmatpush1.msra.mxu1 %v362_v32  ;;  %v808_v43 = vpack.i.bf16 %v288_v37, %v308_v38  ;;  %v351_v48 = vld [vmem:[%s1313_s2 + $0xf8] sm:$0xff]  ;;  %v348_v49 = vld [vmem:[%s1313_s2 + $0xe0] sm:$0xff]  ;;  %v350_v50 = vld [vmem:[%s1313_s2 + $0xf0] sm:$0xff] }
  0x19   : > { %804 = vrot.lane.b32.xlu0 %v803_v36, %s845_s9  ;;  %460 = vmatprep.subr.mxu0 %v357_v35  ;;  %v345_v51 = vld [vmem:[%s1313_s2 + $0xc8] sm:$0xff]  ;;  %v347_v52 = vld [vmem:[%s1313_s2 + $0xd8] sm:$0xff]  ;;  %v344_v53 = vld [vmem:[%s1313_s2 + $0xc0] sm:$0xff] }
  0x1a   : > { %537 = vmatprep.subr.mxu1 %v359_v39  ;;  %461 = vmatpush1.msra.mxu0 %v356_v40  ;;  %v346_v54 = vld [vmem:[%s1313_s2 + $0xd0] sm:$0xff]  ;;  %v341_v55 = vld [vmem:[%s1313_s2 + $0xa8] sm:$0xff]  ;;  %v343_v56 = vld [vmem:[%s1313_s2 + $0xb8] sm:$0xff] }
  0x1b   : > { %538 = vmatpush1.msra.mxu1 %v358_v41  ;;  %462 = vmatprep.subr.mxu0 %v353_v42  ;;  %v340_v57 = vld [vmem:[%s1313_s2 + $0xa0] sm:$0xff]  ;;  %v342_v58 = vld [vmem:[%s1313_s2 + $0xb0] sm:$0xff]  ;;  %v337_v59 = vld [vmem:[%s1313_s2 + $0x88] sm:$0xff] }
  0x1c   : > { %539 = vmatprep.subr.mxu1 %v355_v44  ;;  %463 = vmatpush1.msra.mxu0 %v352_v45  ;;  %v339_v60 = vld [vmem:[%s1313_s2 + $0x98] sm:$0xff]  ;;  %v336_v61 = vld [vmem:[%s1313_s2 + $0x80] sm:$0xff]  ;;  %v338_v62 = vld [vmem:[%s1313_s2 + $0x90] sm:$0xff] }
  0x1d   : > { %809 = vrot.lane.b32.xlu0 %v808_v43, %s845_s9  ;;  %540 = vmatpush1.msra.mxu1 %v354_v46  ;;  %v333_v63 = vld [vmem:[%s1313_s2 + $0x68] sm:$0xff]  ;;  %v335_v0 = vld [vmem:[%s1313_s2 + $0x78] sm:$0xff]  ;;  %v332_v1 = vld [vmem:[%s1313_s2 + $0x60] sm:$0xff] }
  0x1e   : > { %464 = vmatprep.subr.mxu0 %v349_v47  ;;  %541 = vmatprep.subr.mxu1 %v351_v48  ;;  %v334_v2 = vld [vmem:[%s1313_s2 + $0x70] sm:$0xff]  ;;  %v329_v3 = vld [vmem:[%s1313_s2 + $0x48] sm:$0xff]  ;;  %v331_v4 = vld [vmem:[%s1313_s2 + $0x58] sm:$0xff] }
  0x1f   : > { %465 = vmatpush1.msra.mxu0 %v348_v49  ;;  %542 = vmatpush1.msra.mxu1 %v350_v50  ;;  %v328_v5 = vld [vmem:[%s1313_s2 + $0x40] sm:$0xff]  ;;  %v330_v6 = vld [vmem:[%s1313_s2 + $0x50] sm:$0xff]  ;;  %v325_v7 = vld [vmem:[%s1313_s2 + $0x28] sm:$0xff] }
  0x20   : > { %466 = vmatprep.subr.mxu0 %v345_v51  ;;  %543 = vmatprep.subr.mxu1 %v347_v52  ;;  %v327_v8 = vld [vmem:[%s1313_s2 + $0x38] sm:$0xff]  ;;  %v324_v9 = vld [vmem:[%s1313_s2 + $0x20] sm:$0xff]  ;;  %v326_v10 = vld [vmem:[%s1313_s2 + $0x30] sm:$0xff] }
  0x21   : > { %467 = vmatpush1.msra.mxu0 %v344_v53  ;;  %544 = vmatpush1.msra.mxu1 %v346_v54  ;;  %v321_v11 = vld [vmem:[%s1313_s2 + $0x8] sm:$0xff]  ;;  %v323_v12 = vld [vmem:[%s1313_s2 + $0x18] sm:$0xff]  ;;  %v320_v13 = vld [vmem:[%s1313_s2] sm:$0xff] }
  0x22   : > { %468 = vmatprep.subr.mxu0 %v341_v55  ;;  %545 = vmatprep.subr.mxu1 %v343_v56  ;;  %v322_v14 = vld [vmem:[%s1313_s2 + $0x10] sm:$0xff]  ;;  %v445_v15 = vld [vmem:[%s1313_s2 + $0x3e8] sm:$0xff]  ;;  %v447_v16 = vld [vmem:[%s1313_s2 + $0x3f8] sm:$0xff] }
  0x23   : > { %469 = vmatpush1.msra.mxu0 %v340_v57  ;;  %546 = vmatpush1.msra.mxu1 %v342_v58  ;;  %v444_v17 = vld [vmem:[%s1313_s2 + $0x3e0] sm:$0xff]  ;;  %v446_v18 = vld [vmem:[%s1313_s2 + $0x3f0] sm:$0xff]  ;;  %v441_v19 = vld [vmem:[%s1313_s2 + $0x3c8] sm:$0xff] }
  0x24   : > { %470 = vmatprep.subr.mxu0 %v337_v59  ;;  %547 = vmatprep.subr.mxu1 %v339_v60  ;;  %v443_v22 = vld [vmem:[%s1313_s2 + $0x3d8] sm:$0xff]  ;;  %v440_v23 = vld [vmem:[%s1313_s2 + $0x3c0] sm:$0xff]  ;;  %v442_v24 = vld [vmem:[%s1313_s2 + $0x3d0] sm:$0xff] }
  0x25   : > { %471 = vmatpush1.msra.mxu0 %v336_v61  ;;  %548 = vmatpush1.msra.mxu1 %v338_v62  ;;  %v437_v25 = vld [vmem:[%s1313_s2 + $0x3a8] sm:$0xff]  ;;  %v439_v26 = vld [vmem:[%s1313_s2 + $0x3b8] sm:$0xff]  ;;  %v436_v28 = vld [vmem:[%s1313_s2 + $0x3a0] sm:$0xff] }
  0x26   : > { %472 = vmatprep.subr.mxu0 %v333_v63  ;;  %549 = vmatprep.subr.mxu1 %v335_v0  ;;  %v438_v29 = vld [vmem:[%s1313_s2 + $0x3b0] sm:$0xff]  ;;  %v433_v30 = vld [vmem:[%s1313_s2 + $0x388] sm:$0xff]  ;;  %v435_v31 = vld [vmem:[%s1313_s2 + $0x398] sm:$0xff] }
  0x27   : > { %473 = vmatpush1.msra.mxu0 %v332_v1  ;;  %550 = vmatpush1.msra.mxu1 %v334_v2  ;;  %v432_v32 = vld [vmem:[%s1313_s2 + $0x380] sm:$0xff]  ;;  %v434_v33 = vld [vmem:[%s1313_s2 + $0x390] sm:$0xff]  ;;  %v429_v34 = vld [vmem:[%s1313_s2 + $0x368] sm:$0xff] }
  0x28   : > { %474 = vmatprep.subr.mxu0 %v329_v3  ;;  %551 = vmatprep.subr.mxu1 %v331_v4  ;;  %v431_v35 = vld [vmem:[%s1313_s2 + $0x378] sm:$0xff]  ;;  %v428_v36 = vld [vmem:[%s1313_s2 + $0x360] sm:$0xff]  ;;  %v430_v37 = vld [vmem:[%s1313_s2 + $0x370] sm:$0xff] }
  0x29   : > { %475 = vmatpush1.msra.mxu0 %v328_v5  ;;  %552 = vmatpush1.msra.mxu1 %v330_v6  ;;  %v425_v38 = vld [vmem:[%s1313_s2 + $0x348] sm:$0xff]  ;;  %v427_v39 = vld [vmem:[%s1313_s2 + $0x358] sm:$0xff]  ;;  %v424_v40 = vld [vmem:[%s1313_s2 + $0x340] sm:$0xff] }
  0x2a   : > { %476 = vmatprep.subr.mxu0 %v325_v7  ;;  %553 = vmatprep.subr.mxu1 %v327_v8  ;;  %v426_v41 = vld [vmem:[%s1313_s2 + $0x350] sm:$0xff]  ;;  %v421_v42 = vld [vmem:[%s1313_s2 + $0x328] sm:$0xff]  ;;  %v423_v43 = vld [vmem:[%s1313_s2 + $0x338] sm:$0xff] }
  0x2b   : > { %477 = vmatpush1.msra.mxu0 %v324_v9  ;;  %554 = vmatpush1.msra.mxu1 %v326_v10  ;;  %v420_v44 = vld [vmem:[%s1313_s2 + $0x320] sm:$0xff]  ;;  %v422_v45 = vld [vmem:[%s1313_s2 + $0x330] sm:$0xff]  ;;  %v417_v46 = vld [vmem:[%s1313_s2 + $0x308] sm:$0xff] }
  0x2c   : > { %478 = vmatprep.subr.mxu0 %v321_v11  ;;  %555 = vmatprep.subr.mxu1 %v323_v12  ;;  %v419_v47 = vld [vmem:[%s1313_s2 + $0x318] sm:$0xff]  ;;  %v416_v48 = vld [vmem:[%s1313_s2 + $0x300] sm:$0xff]  ;;  %v418_v49 = vld [vmem:[%s1313_s2 + $0x310] sm:$0xff] }
  0x2d   : > { %479 = vmatpush1.msra.mxu0 %v320_v13  ;;  %556 = vmatpush1.msra.mxu1 %v322_v14  ;;  %v413_v50 = vld [vmem:[%s1313_s2 + $0x2e8] sm:$0xff]  ;;  %v415_v51 = vld [vmem:[%s1313_s2 + $0x2f8] sm:$0xff]  ;;  %v412_v52 = vld [vmem:[%s1313_s2 + $0x2e0] sm:$0xff] }
  0x2e   : > { %480 = vmatprep.subr.mxu0 %v445_v15  ;;  %557 = vmatprep.subr.mxu1 %v447_v16  ;;  %v414_v53 = vld [vmem:[%s1313_s2 + $0x2f0] sm:$0xff]  ;;  %v409_v54 = vld [vmem:[%s1313_s2 + $0x2c8] sm:$0xff]  ;;  %v411_v55 = vld [vmem:[%s1313_s2 + $0x2d8] sm:$0xff] }
  0x2f   : > { %481 = vmatpush2.msra.mxu0 %v444_v17  ;;  %558 = vmatpush2.msra.mxu1 %v446_v18  ;;  %v408_v56 = vld [vmem:[%s1313_s2 + $0x2c0] sm:$0xff]  ;;  %v410_v57 = vld [vmem:[%s1313_s2 + $0x2d0] sm:$0xff]  ;;  %v405_v58 = vld [vmem:[%s1313_s2 + $0x2a8] sm:$0xff]  ;;  %v296_v18 = vrot.slane %v950_v20, 2 }
  0x30   : > { %482 = vmatprep.subr.mxu0 %v441_v19  ;;  %559 = vmatprep.subr.mxu1 %v443_v22  ;;  %v407_v59 = vld [vmem:[%s1313_s2 + $0x2b8] sm:$0xff]  ;;  %v404_v60 = vld [vmem:[%s1313_s2 + $0x2a0] sm:$0xff]  ;;  %v406_v61 = vld [vmem:[%s1313_s2 + $0x2b0] sm:$0xff]  ;;  %v297_v19 = vrot.slane %v952_v21, 2 }
  0x31   : > { %483 = vmatpush2.msra.mxu0 %v440_v23  ;;  %560 = vmatpush2.msra.mxu1 %v442_v24  ;;  %v401_v62 = vld [vmem:[%s1313_s2 + $0x288] sm:$0xff]  ;;  %v403_v63 = vld [vmem:[%s1313_s2 + $0x298] sm:$0xff]  ;;  %v400_v0 = vld [vmem:[%s1313_s2 + $0x280] sm:$0xff]  ;;  %v299_v24 = vrot.slane %v964_v27, 2 }
  0x32   : > { %484 = vmatprep.subr.mxu0 %v437_v25  ;;  %561 = vmatprep.subr.mxu1 %v439_v26  ;;  %v402_v1 = vld [vmem:[%s1313_s2 + $0x290] sm:$0xff]  ;;  %v397_v2 = vld [vmem:[%s1313_s2 + $0x268] sm:$0xff]  ;;  %v399_v3 = vld [vmem:[%s1313_s2 + $0x278] sm:$0xff]  ;;  %v298_v23 = vsel %vm295_vm2, %v296_v18, %v297_v19 }
  0x33   : > { %485 = vmatpush2.msra.mxu0 %v436_v28  ;;  %562 = vmatpush2.msra.mxu1 %v438_v29  ;;  %v396_v4 = vld [vmem:[%s1313_s2 + $0x260] sm:$0xff]  ;;  %v398_v5 = vld [vmem:[%s1313_s2 + $0x270] sm:$0xff]  ;;  %v393_v6 = vld [vmem:[%s1313_s2 + $0x248] sm:$0xff] }
  0x34   : > { %486 = vmatprep.subr.mxu0 %v433_v30  ;;  %563 = vmatprep.subr.mxu1 %v435_v31  ;;  %v395_v7 = vld [vmem:[%s1313_s2 + $0x258] sm:$0xff]  ;;  %v392_v8 = vld [vmem:[%s1313_s2 + $0x240] sm:$0xff]  ;;  %v394_v9 = vld [vmem:[%s1313_s2 + $0x250] sm:$0xff]  ;;  %v300_v31 = vsel %vm295_vm2, %v297_v19, %v299_v24 }
  0x35   : > { %487 = vmatpush2.msra.mxu0 %v432_v32  ;;  %564 = vmatpush2.msra.mxu1 %v434_v33  ;;  %v389_v10 = vld [vmem:[%s1313_s2 + $0x228] sm:$0xff]  ;;  %v391_v11 = vld [vmem:[%s1313_s2 + $0x238] sm:$0xff]  ;;  %v388_v12 = vld [vmem:[%s1313_s2 + $0x220] sm:$0xff] }
  0x36   : > { %488 = vmatprep.subr.mxu0 %v429_v34  ;;  %565 = vmatprep.subr.mxu1 %v431_v35  ;;  %v390_v13 = vld [vmem:[%s1313_s2 + $0x230] sm:$0xff]  ;;  %v385_v14 = vld [vmem:[%s1313_s2 + $0x208] sm:$0xff]  ;;  %v387_v15 = vld [vmem:[%s1313_s2 + $0x218] sm:$0xff] }
  0x37   : > { %489 = vmatpush2.msra.mxu0 %v428_v36  ;;  %566 = vmatpush2.msra.mxu1 %v430_v37  ;;  %v384_v16 = vld [vmem:[%s1313_s2 + $0x200] sm:$0xff]  ;;  %v386_v17 = vld [vmem:[%s1313_s2 + $0x210] sm:$0xff] }
  0x38   : > { %490 = vmatprep.subr.mxu0 %v425_v38  ;;  %567 = vmatprep.subr.mxu1 %v427_v39 }
  0x39   : > { %491 = vmatpush2.msra.mxu0 %v424_v40  ;;  %568 = vmatpush2.msra.mxu1 %v426_v41 }
  0x3a   : > { %492 = vmatprep.subr.mxu0 %v421_v42  ;;  %569 = vmatprep.subr.mxu1 %v423_v43 }
  0x3b   : > { %493 = vmatpush2.msra.mxu0 %v420_v44  ;;  %570 = vmatpush2.msra.mxu1 %v422_v45 }
  0x3c   : > { %494 = vmatprep.subr.mxu0 %v417_v46  ;;  %571 = vmatprep.subr.mxu1 %v419_v47 }
  0x3d   : > { %495 = vmatpush2.msra.mxu0 %v416_v48  ;;  %572 = vmatpush2.msra.mxu1 %v418_v49 }
  0x3e   : > { %496 = vmatprep.subr.mxu0 %v413_v50  ;;  %573 = vmatprep.subr.mxu1 %v415_v51 }
  0x3f   : > { %497 = vmatpush2.msra.mxu0 %v412_v52  ;;  %574 = vmatpush2.msra.mxu1 %v414_v53 }
  0x40   : > { %498 = vmatprep.subr.mxu0 %v409_v54  ;;  %575 = vmatprep.subr.mxu1 %v411_v55 }
  0x41   : > { %499 = vmatpush2.msra.mxu0 %v408_v56  ;;  %576 = vmatpush2.msra.mxu1 %v410_v57 }
  0x42   : > { %500 = vmatprep.subr.mxu0 %v405_v58  ;;  %577 = vmatprep.subr.mxu1 %v407_v59 }
  0x43   : > { %501 = vmatpush2.msra.mxu0 %v404_v60  ;;  %578 = vmatpush2.msra.mxu1 %v406_v61 }
  0x44   : > { %502 = vmatprep.subr.mxu0 %v401_v62  ;;  %579 = vmatprep.subr.mxu1 %v403_v63 }
  0x45   : > { %503 = vmatpush2.msra.mxu0 %v400_v0  ;;  %580 = vmatpush2.msra.mxu1 %v402_v1 }
  0x46   : > { %504 = vmatprep.subr.mxu0 %v397_v2  ;;  %581 = vmatprep.subr.mxu1 %v399_v3 }
  0x47   : > { %505 = vmatpush2.msra.mxu0 %v396_v4  ;;  %582 = vmatpush2.msra.mxu1 %v398_v5 }
  0x48   : > { %506 = vmatprep.subr.mxu0 %v393_v6  ;;  %583 = vmatprep.subr.mxu1 %v395_v7 }
  0x49   : > { %507 = vmatpush2.msra.mxu0 %v392_v8  ;;  %584 = vmatpush2.msra.mxu1 %v394_v9 }
  0x4a   : > { %508 = vmatprep.subr.mxu0 %v389_v10  ;;  %585 = vmatprep.subr.mxu1 %v391_v11 }
  0x4b   : > { %509 = vmatpush2.msra.mxu0 %v388_v12  ;;  %586 = vmatpush2.msra.mxu1 %v390_v13 }
  0x4c   : > { %510 = vmatprep.subr.mxu0 %v385_v14  ;;  %587 = vmatprep.subr.mxu1 %v387_v15 }
  0x4d   : > { %511 = vmatpush2.msra.mxu0 %v384_v16  ;;  %588 = vmatpush2.msra.mxu1 %v386_v17 }
  0x8b   : > { %v805_v22 = vpop.permute.xlu0 %804 }
  0x8c   : > { %v807_v25 = vunpack.i.h.bf16 %v805_v22  ;;  %v806_v26 = vunpack.i.l.bf16 %v805_v22 }
  0x8e   : > { %v318_v28 = vsel %vm315_vm3, %v298_v23, %v806_v26  ;;  %v316_v29 = vsel %vm315_vm3, %v950_v20, %v807_v25 }
  0x8f   : > { %v810_v30 = vpop.permute.xlu0 %809  ;;  %512 = vmatprep.mubr.f32.mxu0 %v318_v28  ;;  %589 = vmatprep.mubr.f32.mxu1 %v318_v28 }
  0x90   : > { %v812_v32 = vunpack.i.h.bf16 %v810_v30  ;;  %v811_v33 = vunpack.i.l.bf16 %v810_v30  ;;  %513 = vmatmul.mubr.f32.vlgmr.msra.gmra.mxu0 %v316_v29  ;;  %590 = vmatmul.mubr.f32.vlgmr.msra.gmra.mxu1 %v316_v29 }
  0x92   : > { %v319_v34 = vsel %vm315_vm3, %v300_v31, %v811_v33  ;;  %v317_v35 = vsel %vm315_vm3, %v952_v21, %v812_v32 }
  0x93   : > { %518 = vmatprep.mubr.f32.mxu0 %v319_v34  ;;  %595 = vmatprep.mubr.f32.mxu1 %v319_v34 }
  0x94   : > { %519 = vmatmul.mubr.f32.gmra.mxu0 %v317_v35  ;;  %596 = vmatmul.mubr.f32.gmra.mxu1 %v317_v35 }
 0x150   : > { %v514_v27 = vpop.f32.mrf.mxu0  ;;  %v591_v36 = vpop.f32.mrf.mxu1 }
 0x151   : > { %v602_v37 = vmul.f32 %v514_v27, %v514_v27  ;;  %v606_v38 = vmul.f32 %v591_v36, %v591_v36 }
 0x152   : > { %v516_v20 = vpop.f32.mrf.mxu0  ;;  %v593_v39 = vpop.f32.mrf.mxu1 }
 0x153   : > { %v610_v40 = vadd.f32 %v606_v38, %v602_v37  ;;  %v603_v41 = vmul.f32 %v516_v20, %v516_v20  ;;  %v607_v42 = vmul.f32 %v593_v39, %v593_v39 }
 0x154   : > { %v520_v43 = vpop.f32.mrf.mxu0  ;;  %v597_v44 = vpop.f32.mrf.mxu1 }
 0x155   : > { %v614_v45 = vadd.f32 1e-12, %v610_v40  ;;  %v611_v46 = vadd.f32 %v607_v42, %v603_v41  ;;  %v604_v47 = vmul.f32 %v520_v43, %v520_v43  ;;  %v608_v21 = vmul.f32 %v597_v44, %v597_v44 }
 0x156   : > { %v522_v48 = vpop.f32.mrf.mxu0  ;;  %v599_v49 = vpop.f32.mrf.mxu1 }
 0x157   : > { %813 = vrsqrt.f32 %v614_v45  ;;  %v615_v50 = vadd.f32 1e-12, %v611_v46  ;;  %v612_v51 = vadd.f32 %v608_v21, %v604_v47  ;;  %v605_v52 = vmul.f32 %v522_v48, %v522_v48 }
 0x158   : > { %v609_v53 = vmul.f32 %v599_v49, %v599_v49  ;;  %vm620_vm4 = vcmp.eq.f32.partialorder %v614_v45, inf  ;;  %v623_v59 = vand.u32 2147483648, %v614_v45  ;;  %vm622_vm5 = vcmp.eq.f32.partialorder %v614_v45, 0.0 }
 0x159   : > { %815 = vrsqrt.f32 %v615_v50  ;;  %v616_v54 = vadd.f32 1e-12, %v612_v51  ;;  %vm627_vm6 = vcmp.eq.f32.partialorder %v615_v50, inf  ;;  %v630_v0 = vand.u32 2147483648, %v615_v50 }
 0x15a   : > { %v613_v55 = vadd.f32 %v609_v53, %v605_v52  ;;  %vm629_vm7 = vcmp.eq.f32.partialorder %v615_v50, 0.0 }
 0x15b   : > { %817 = vrsqrt.f32 %v616_v54  ;;  %vm634_vm8 = vcmp.eq.f32.partialorder %v616_v54, inf  ;;  %v637_v5 = vand.u32 2147483648, %v616_v54  ;;  %vm636_vm9 = vcmp.eq.f32.partialorder %v616_v54, 0.0 }
 0x15c   : > { %v617_v56 = vadd.f32 1e-12, %v613_v55 }
 0x15e   : > { %819 = vrsqrt.f32 %v617_v56  ;;  %vm641_vm10 = vcmp.eq.f32.partialorder %v617_v56, inf  ;;  %v644_v10 = vand.u32 2147483648, %v617_v56  ;;  %vm643_vm11 = vcmp.eq.f32.partialorder %v617_v56, 0.0 }
 0x164   : > { %v814_v57 = vpop.eup %813 }
 0x165   : > { %v619_v58 = vmul.f32 %v814_v57, %v614_v45 }
 0x166   : > { %v816_v60 = vpop.eup %815 }
 0x167   : > { %v621_v61 = vsel %vm620_vm4, %v614_v45, %v619_v58  ;;  %v626_v63 = vmul.f32 %v816_v60, %v615_v50 }
 0x168   : > { %v624_v62 = vsel %vm622_vm5, %v623_v59, %v621_v61  ;;  %v818_v1 = vpop.eup %817 }
 0x169   : > { %646 = vst [vmem:[%s275_s4] sm:$0xff] %v624_v62  ;;  %v628_v2 = vsel %vm627_vm6, %v615_v50, %v626_v63  ;;  %v633_v4 = vmul.f32 %v818_v1, %v616_v54 }
 0x16a   : > { %v631_v3 = vsel %vm629_vm7, %v630_v0, %v628_v2 }
 0x16b   : > { %647 = vst [vmem:[%s275_s4 + $0x8] sm:$0xff] %v631_v3  ;;  %v820_v6 = vpop.eup %819  ;;  %v635_v7 = vsel %vm634_vm8, %v616_v54, %v633_v4 }
 0x16c   : > { %v638_v8 = vsel %vm636_vm9, %v637_v5, %v635_v7  ;;  %v640_v9 = vmul.f32 %v820_v6, %v617_v56 }
 0x16d   : > { %648 = vst [vmem:[%s275_s4 + $0x10] sm:$0xff] %v638_v8 }
 0x16e   : > { %v642_v11 = vsel %vm641_vm10, %v617_v56, %v640_v9 }
 0x16f   : > { %v645_v12 = vsel %vm643_vm11, %v644_v10, %v642_v11 }
 0x170   : > { %649 = vst [vmem:[%s275_s4 + $0x18] sm:$0xff] %v645_v12 }
 0x171 PF: > { %s13_s14 = sadd.s32 1, %s843_s14   ;;  %s1315_s12 = smov %s839_s13 }
 0x172   : > { %p10_p5 = scmp.ge.s32.totalorder %s13_s14, 6   ;;  %s1316_s13 = smov %s1318_s15 }
 0x174   :  { %12 = sbr.rel (!%p10_p5) target bundleno = 2 (0x2), region = 65 }

// kernel: multiscale_fft.3
= control target key start
LH: loop header
LB: loop body
LE: loop exit
PB: predicated region body
PF: predicated region fallthrough
CT: control target
= control target key end

     0   :  { %s803_s12 = smov 0   ;;  %s805_s13 = smov 0   ;;  %s992_s0 = inlined_call_operand.vmem [shape: f32[4,40,32], index: 0, kind: input, shape index: {}, may-alias: {0,1}]   ;;  %s993_s1 = inlined_call_operand.vmem [shape: f32[4,40,32], index: 1, kind: input, shape index: {}, may-alias: {0,1}]   ;;  %s994_s2 = inlined_call_operand.vmem [shape: f32[128,256], index: 2, kind: input, shape index: {}]   ;;  %s995_s3 = inlined_call_operand.vmem [shape: f32[4,32,128], index: 3, kind: output, shape index: {}]  }
   0x1   :  { %s807_s14 = smov 0  }
   0x2 LB: > { %s25_s15 = sadd.s32 1, %s773_s13  ;;  %p644_p0 = scmp.ge.s32.totalorder %s777_s14, 1  ;;  %s777_s14 = sphi %s807_s14, %s13_s14   ;;  %s773_s13 = sphi %s805_s13, %s997_s13   ;;  %s769_s12 = sphi %s803_s12, %s996_s12  }
   0x3   : > { %p27_p1 = scmp.ge.s32.totalorder %s25_s15, 4  ;;  %p189_p2 = scmp.lt.s32.totalorder %s777_s14, 5 }
   0x5   : > { %s999_s15 = smov (%p27_p1, %s25_s15), 0  ;;  %p190_p3 = pnand %p644_p0, %p189_p2 }
   0x6   : > { %p240_p4 = scmp.lt.s32.totalorder (!%p190_p3), %s769_s12, 3  ;;  %s779_s4 = smov (!%p190_p3), 32  }
   0x7   : > { %193 = sbr.rel (%p190_p3) target bundleno = 373 (0x175), region = 32  ;;  %s780_s5 = smov (!%p190_p3), 96  }
   0x8   : > { %s781_s16 = smov (!%p190_p3), 64  }
   0xc   : > { %v397_v0 = vld [vmem:[%s994_s2 + $0xf8] sm:$0xff]  ;;  %v396_v1 = vld [vmem:[%s994_s2 + $0xf0] sm:$0xff]  ;;  %v395_v2 = vld [vmem:[%s994_s2 + $0xe8] sm:$0xff]  ;;  %s1001_s12 = smov (!%p240_p4, %s769_s12), 3  ;;  %vm285_vm0 = vcmask 1046528   ;;  %vm329_vm1 = vcmask 1044480  }
   0xd   : > { %398 = vmatprep.subr.mxu0 %v397_v0  ;;  %654 = vmatprep.subr.mxu1 %v397_v0  ;;  %v394_v3 = vld [vmem:[%s994_s2 + $0xe0] sm:$0xff]  ;;  %v393_v4 = vld [vmem:[%s994_s2 + $0xd8] sm:$0xff]  ;;  %v392_v5 = vld [vmem:[%s994_s2 + $0xd0] sm:$0xff]  ;;  %s686_s28 = smul.u32 40, %s1001_s12  ;;  %vm307_vm2 = vcmask 1045504   ;;  %vm351_vm3 = vcmask 261120  }
   0xe   : > { %399 = vmatpush1.msra.mxu0 %v396_v1  ;;  %670 = vmatpush1.msra.mxu1 %v396_v1  ;;  %v391_v6 = vld [vmem:[%s994_s2 + $0xc8] sm:$0xff]  ;;  %v390_v7 = vld [vmem:[%s994_s2 + $0xc0] sm:$0xff]  ;;  %v389_v8 = vld [vmem:[%s994_s2 + $0xb8] sm:$0xff]  ;;  %vm356_vm4 = vcmask 523264   ;;  %vm361_vm5 = vcmask 785408   ;;  %s653_s22 = sshll.u32 %s1001_s12, 5 }
   0xf   : > { %400 = vmatprep.subr.mxu0 %v395_v2  ;;  %655 = vmatprep.subr.mxu1 %v395_v2  ;;  %s247_s8 = scalar_lea.vmem %s992_s0, %s686_s28  ;;  %s851_s9 = sadd.s32 32, %s686_s28  ;;  %v388_v9 = vld [vmem:[%s994_s2 + $0xb0] sm:$0xff]  ;;  %v387_v18 = vld [vmem:[%s994_s2 + $0xa8] sm:$0xff]  ;;  %v386_v23 = vld [vmem:[%s994_s2 + $0xa0] sm:$0xff] }
  0x10   : > { %401 = vmatpush1.msra.mxu0 %v394_v3  ;;  %671 = vmatpush1.msra.mxu1 %v394_v3  ;;  %v859_v10 = vld [vmem:[%s247_s8] sm:$0xff]  ;;  %v861_v11 = vld [vmem:[%s247_s8 + $0x8] sm:$0xff]  ;;  %v863_v12 = vld [vmem:[%s247_s8 + $0x10] sm:$0xff]  ;;  %s262_s20 = scalar_lea.vmem %s993_s1, %s851_s9  ;;  %s273_s25 = scalar_lea.vmem %s995_s3, %s653_s22 }
  0x11   : > { %402 = vmatprep.subr.mxu0 %v393_v4  ;;  %656 = vmatprep.subr.mxu1 %v393_v4  ;;  %v869_v13 = vld [vmem:[%s247_s8 + $0x18] sm:$0xff]  ;;  %v286_v14 = vrot.slane %v859_v10, 1  ;;  %v287_v15 = vrot.slane %v861_v11, 1  ;;  %v289_v16 = vrot.slane %v863_v12, 1  ;;  %v330_v17 = vrot.slane %v859_v10, 3  ;;  %v279_v28 = vld [vmem:[%s262_s20] sm:$0xff] }
  0x12   : > { %403 = vmatpush1.msra.mxu0 %v392_v5  ;;  %672 = vmatpush1.msra.mxu1 %v392_v5  ;;  %v291_v19 = vrot.slane %v869_v13, 1  ;;  %v331_v20 = vrot.slane %v861_v11, 3  ;;  %v333_v21 = vrot.slane %v863_v12, 3  ;;  %v335_v22 = vrot.slane %v869_v13, 3  ;;  %v385_v29 = vld [vmem:[%s994_s2 + $0x98] sm:$0xff]  ;;  %v384_v37 = vld [vmem:[%s994_s2 + $0x90] sm:$0xff] }
  0x13   : > { %404 = vmatprep.subr.mxu0 %v391_v6  ;;  %657 = vmatprep.subr.mxu1 %v391_v6  ;;  %v288_v24 = vsel %vm285_vm0, %v286_v14, %v287_v15  ;;  %v308_v25 = vrot.slane %v859_v10, 2  ;;  %v309_v26 = vrot.slane %v861_v11, 2  ;;  %v311_v27 = vrot.slane %v863_v12, 2  ;;  %v383_v42 = vld [vmem:[%s994_s2 + $0x88] sm:$0xff]  ;;  %v382_v46 = vld [vmem:[%s994_s2 + $0x80] sm:$0xff]  ;;  %v381_v52 = vld [vmem:[%s994_s2 + $0x78] sm:$0xff] }
  0x14   : > { %405 = vmatpush1.msra.mxu0 %v390_v7  ;;  %673 = vmatpush1.msra.mxu1 %v390_v7  ;;  %v292_v30 = vsel %vm285_vm0, %v289_v16, %v291_v19  ;;  %v332_v31 = vsel %vm329_vm1, %v330_v17, %v331_v20  ;;  %v336_v32 = vsel %vm329_vm1, %v333_v21, %v335_v22  ;;  %v313_v33 = vrot.slane %v869_v13, 2  ;;  %v380_v53 = vld [vmem:[%s994_s2 + $0x70] sm:$0xff]  ;;  %v379_v56 = vld [vmem:[%s994_s2 + $0x68] sm:$0xff]  ;;  %v378_v57 = vld [vmem:[%s994_s2 + $0x60] sm:$0xff] }
  0x15   : > { %406 = vmatprep.subr.mxu0 %v389_v8  ;;  %658 = vmatprep.subr.mxu1 %v389_v8  ;;  %v717_v34 = vpack.i.bf16 %v292_v30, %v288_v24  ;;  %v727_v35 = vpack.i.bf16 %v336_v32, %v332_v31  ;;  %v310_v36 = vsel %vm307_vm2, %v308_v25, %v309_v26  ;;  %v293_v40 = vrot.slane %v279_v28, 1  ;;  %v377_v58 = vld [vmem:[%s994_s2 + $0x58] sm:$0xff]  ;;  %v376_v59 = vld [vmem:[%s994_s2 + $0x50] sm:$0xff]  ;;  %v375_v60 = vld [vmem:[%s994_s2 + $0x48] sm:$0xff] }
  0x16   : > { %407 = vmatpush1.msra.mxu0 %v388_v9  ;;  %674 = vmatpush1.msra.mxu1 %v388_v9  ;;  %v314_v38 = vsel %vm307_vm2, %v311_v27, %v313_v33  ;;  %v290_v39 = vsel %vm285_vm0, %v287_v15, %v289_v16  ;;  %v315_v41 = vrot.slane %v279_v28, 2  ;;  %v312_v44 = vsel %vm307_vm2, %v309_v26, %v311_v27  ;;  %v374_v61 = vld [vmem:[%s994_s2 + $0x40] sm:$0xff]  ;;  %v373_v62 = vld [vmem:[%s994_s2 + $0x38] sm:$0xff]  ;;  %v372_v63 = vld [vmem:[%s994_s2 + $0x30] sm:$0xff] }
  0x17   : > { %408 = vmatprep.subr.mxu0 %v387_v18  ;;  %659 = vmatprep.subr.mxu1 %v387_v18  ;;  %v722_v43 = vpack.i.bf16 %v314_v38, %v310_v36  ;;  %v337_v45 = vrot.slane %v279_v28, 3  ;;  %v294_v47 = vsel %vm285_vm0, %v291_v19, %v293_v40  ;;  %v334_v49 = vsel %vm329_vm1, %v331_v20, %v333_v21  ;;  %v371_v0 = vld [vmem:[%s994_s2 + $0x28] sm:$0xff]  ;;  %v370_v1 = vld [vmem:[%s994_s2 + $0x20] sm:$0xff]  ;;  %v369_v2 = vld [vmem:[%s994_s2 + $0x18] sm:$0xff] }
  0x18   : > { %409 = vmatpush1.msra.mxu0 %v386_v23  ;;  %675 = vmatpush1.msra.mxu1 %v386_v23  ;;  %v316_v48 = vsel %vm307_vm2, %v313_v33, %v315_v41  ;;  %v732_v50 = vpack.i.bf16 %v294_v47, %v290_v39  ;;  %v368_v3 = vld [vmem:[%s994_s2 + $0x10] sm:$0xff]  ;;  %v367_v4 = vld [vmem:[%s994_s2 + $0x8] sm:$0xff]  ;;  %v366_v5 = vld [vmem:[%s994_s2] sm:$0xff]  ;;  %v782_v6 = vmov 0.0  }
  0x19   : > { %410 = vmatprep.subr.mxu0 %v385_v29  ;;  %718 = vrot.lane.b32.xlu0 %v717_v34, %s779_s4  ;;  %v338_v51 = vsel %vm329_vm1, %v335_v22, %v337_v45  ;;  %v737_v54 = vpack.i.bf16 %v316_v48, %v312_v44 }
  0x1a   : > { %728 = vrot.lane.b32.xlu1 %v727_v35, %s780_s5  ;;  %660 = vmatprep.subr.mxu1 %v385_v29  ;;  %v742_v55 = vpack.i.bf16 %v338_v51, %v334_v49 }
  0x1b   : > { %411 = vmatpush1.msra.mxu0 %v384_v37  ;;  %676 = vmatpush1.msra.mxu1 %v384_v37 }
  0x1c   : > { %412 = vmatprep.subr.mxu0 %v383_v42  ;;  %661 = vmatprep.subr.mxu1 %v383_v42 }
  0x1d   : > { %413 = vmatpush1.msra.mxu0 %v382_v46  ;;  %723 = vrot.lane.b32.xlu0 %v722_v43, %s781_s16 }
  0x1e   : > { %733 = vrot.lane.b32.xlu1 %v732_v50, %s779_s4  ;;  %677 = vmatpush1.msra.mxu1 %v382_v46 }
  0x1f   : > { %414 = vmatprep.subr.mxu0 %v381_v52  ;;  %662 = vmatprep.subr.mxu1 %v381_v52 }
  0x20   : > { %415 = vmatpush1.msra.mxu0 %v380_v53  ;;  %678 = vmatpush1.msra.mxu1 %v380_v53 }
  0x21   : > { %416 = vmatprep.subr.mxu0 %v379_v56  ;;  %738 = vrot.lane.b32.xlu0 %v737_v54, %s781_s16 }
  0x22   : > { %743 = vrot.lane.b32.xlu1 %v742_v55, %s780_s5  ;;  %663 = vmatprep.subr.mxu1 %v379_v56 }
  0x23   : > { %417 = vmatpush1.msra.mxu0 %v378_v57  ;;  %679 = vmatpush1.msra.mxu1 %v378_v57 }
  0x24   : > { %418 = vmatprep.subr.mxu0 %v377_v58  ;;  %664 = vmatprep.subr.mxu1 %v377_v58 }
  0x25   : > { %419 = vmatpush1.msra.mxu0 %v376_v59  ;;  %680 = vmatpush1.msra.mxu1 %v376_v59 }
  0x26   : > { %420 = vmatprep.subr.mxu0 %v375_v60  ;;  %665 = vmatprep.subr.mxu1 %v375_v60 }
  0x27   : > { %421 = vmatpush1.msra.mxu0 %v374_v61  ;;  %681 = vmatpush1.msra.mxu1 %v374_v61 }
  0x28   : > { %422 = vmatprep.subr.mxu0 %v373_v62  ;;  %666 = vmatprep.subr.mxu1 %v373_v62 }
  0x29   : > { %423 = vmatpush1.msra.mxu0 %v372_v63  ;;  %682 = vmatpush1.msra.mxu1 %v372_v63 }
  0x2a   : > { %424 = vmatprep.subr.mxu0 %v371_v0  ;;  %667 = vmatprep.subr.mxu1 %v371_v0 }
  0x2b   : > { %425 = vmatpush1.msra.mxu0 %v370_v1  ;;  %683 = vmatpush1.msra.mxu1 %v370_v1 }
  0x2c   : > { %426 = vmatprep.subr.mxu0 %v369_v2  ;;  %668 = vmatprep.subr.mxu1 %v369_v2 }
  0x2d   : > { %427 = vmatpush1.msra.mxu0 %v368_v3  ;;  %684 = vmatpush1.msra.mxu1 %v368_v3 }
  0x2e   : > { %428 = vmatprep.subr.mxu0 %v367_v4  ;;  %669 = vmatprep.subr.mxu1 %v367_v4 }
  0x2f   : > { %429 = vmatpush1.msra.mxu0 %v366_v5  ;;  %685 = vmatpush1.msra.mxu1 %v366_v5 }
  0x30   : > { %462 = vmatprep.mubr.f32.mxu0 %v782_v6  ;;  %474 = vmatprep.mubr.f32.mxu1 %v782_v6 }
  0x8b   : > { %v719_v7 = vpop.permute.xlu0 %718 }
  0x8c   : > { %v729_v8 = vpop.permute.xlu1 %728  ;;  %v721_v9 = vunpack.i.h.bf16 %v719_v7  ;;  %v720_v14 = vunpack.i.l.bf16 %v719_v7 }
  0x8d   : > { %v731_v17 = vunpack.i.h.bf16 %v729_v8  ;;  %v730_v18 = vunpack.i.l.bf16 %v729_v8 }
  0x8e   : > { %v352_v23 = vsel %vm351_vm3, %v859_v10, %v720_v14  ;;  %v354_v24 = vsel %vm351_vm3, %v863_v12, %v721_v9 }
  0x8f   : > { %v724_v15 = vpop.permute.xlu0 %723 }
  0x90   : > { %v734_v16 = vpop.permute.xlu1 %733  ;;  %v726_v19 = vunpack.i.h.bf16 %v724_v15  ;;  %v725_v20 = vunpack.i.l.bf16 %v724_v15 }
  0x91   : > { %v736_v21 = vunpack.i.h.bf16 %v734_v16  ;;  %v735_v22 = vunpack.i.l.bf16 %v734_v16 }
  0x92   : > { %v357_v25 = vsel %vm356_vm4, %v352_v23, %v725_v20  ;;  %v359_v26 = vsel %vm356_vm4, %v354_v24, %v726_v19 }
  0x93   : > { %v739_v27 = vpop.permute.xlu0 %738  ;;  %v362_v29 = vsel %vm361_vm5, %v357_v25, %v730_v18  ;;  %v364_v30 = vsel %vm361_vm5, %v359_v26, %v731_v17  ;;  %v353_v10 = vsel %vm351_vm3, %v861_v11, %v735_v22  ;;  %v355_v12 = vsel %vm351_vm3, %v869_v13, %v736_v21 }
  0x94   : > { %v744_v28 = vpop.permute.xlu1 %743  ;;  %v741_v31 = vunpack.i.h.bf16 %v739_v27  ;;  %v740_v32 = vunpack.i.l.bf16 %v739_v27  ;;  %463 = vmatmul.mubr.f32.vlgmr.msra.gmra.mxu0 %v362_v29  ;;  %475 = vmatmul.mubr.f32.vlgmr.msra.gmra.mxu1 %v364_v30 }
  0x95   : > { %v746_v33 = vunpack.i.h.bf16 %v744_v28  ;;  %v745_v34 = vunpack.i.l.bf16 %v744_v28  ;;  %468 = vmatprep.mubr.f32.mxu0 %v782_v6  ;;  %480 = vmatprep.mubr.f32.mxu1 %v782_v6 }
  0x96   : > { %v358_v35 = vsel %vm356_vm4, %v353_v10, %v740_v32  ;;  %v360_v36 = vsel %vm356_vm4, %v355_v12, %v741_v31 }
  0x97   : > { %v363_v37 = vsel %vm361_vm5, %v358_v35, %v745_v34  ;;  %v365_v38 = vsel %vm361_vm5, %v360_v36, %v746_v33 }
  0x98   : > { %469 = vmatmul.mubr.f32.gmra.mxu0 %v363_v37  ;;  %481 = vmatmul.mubr.f32.gmra.mxu1 %v365_v38 }
 0x154   : > { %v464_v39 = vpop.f32.mrf.mxu0  ;;  %v476_v40 = vpop.f32.mrf.mxu1 }
 0x155   : > { %v487_v43 = vmul.f32 %v464_v39, %v464_v39  ;;  %v489_v44 = vmul.f32 %v476_v40, %v476_v40 }
 0x156   : > { %v466_v41 = vpop.f32.mrf.mxu0  ;;  %v478_v42 = vpop.f32.mrf.mxu1 }
 0x157   : > { %v491_v11 = vmul.f32 %v466_v41, %v466_v41  ;;  %v493_v45 = vmul.f32 %v478_v42, %v478_v42 }
 0x158   : > { %v470_v46 = vpop.f32.mrf.mxu0  ;;  %v482_v13 = vpop.f32.mrf.mxu1 }
 0x159   : > { %v495_v47 = vadd.f32 %v491_v11, %v487_v43  ;;  %v497_v48 = vadd.f32 %v493_v45, %v489_v44  ;;  %v488_v55 = vmul.f32 %v470_v46, %v470_v46  ;;  %v490_v56 = vmul.f32 %v482_v13, %v482_v13 }
 0x15a   : > { %v472_v49 = vpop.f32.mrf.mxu0  ;;  %v484_v50 = vpop.f32.mrf.mxu1 }
 0x15b   : > { %v499_v51 = vadd.f32 1e-12, %v495_v47  ;;  %v501_v52 = vadd.f32 1e-12, %v497_v48  ;;  %v492_v53 = vmul.f32 %v472_v49, %v472_v49  ;;  %v494_v54 = vmul.f32 %v484_v50, %v484_v50 }
 0x15d   : > { %747 = vrsqrt.f32 %v499_v51  ;;  %v496_v57 = vadd.f32 %v492_v53, %v488_v55  ;;  %v498_v58 = vadd.f32 %v494_v54, %v490_v56  ;;  %vm505_vm6 = vcmp.eq.f32.partialorder %v499_v51, inf }
 0x15e   : > { %749 = vrsqrt.f32 %v501_v52  ;;  %v508_v0 = vand.u32 2147483648, %v499_v51  ;;  %vm507_vm7 = vcmp.eq.f32.partialorder %v499_v51, 0.0  ;;  %vm519_vm8 = vcmp.eq.f32.partialorder %v501_v52, inf }
 0x15f   : > { %v500_v59 = vadd.f32 1e-12, %v496_v57  ;;  %v502_v60 = vadd.f32 1e-12, %v498_v58  ;;  %v522_v3 = vand.u32 2147483648, %v501_v52  ;;  %vm521_vm9 = vcmp.eq.f32.partialorder %v501_v52, 0.0 }
 0x161   : > { %751 = vrsqrt.f32 %v500_v59  ;;  %vm512_vm10 = vcmp.eq.f32.partialorder %v500_v59, inf  ;;  %v515_v14 = vand.u32 2147483648, %v500_v59  ;;  %vm514_vm11 = vcmp.eq.f32.partialorder %v500_v59, 0.0 }
 0x162   : > { %753 = vrsqrt.f32 %v502_v60  ;;  %vm526_vm12 = vcmp.eq.f32.partialorder %v502_v60, inf  ;;  %v529_v17 = vand.u32 2147483648, %v502_v60  ;;  %vm528_vm13 = vcmp.eq.f32.partialorder %v502_v60, 0.0 }
 0x16a   : > { %v748_v61 = vpop.eup %747 }
 0x16b   : > { %v750_v62 = vpop.eup %749  ;;  %v504_v63 = vmul.f32 %v748_v61, %v499_v51 }
 0x16c   : > { %v518_v1 = vmul.f32 %v750_v62, %v501_v52 }
 0x16d   : > { %v506_v2 = vsel %vm505_vm6, %v499_v51, %v504_v63 }
 0x16e   : > { %v509_v4 = vsel %vm507_vm7, %v508_v0, %v506_v2  ;;  %v520_v5 = vsel %vm519_vm8, %v501_v52, %v518_v1  ;;  %v752_v7 = vpop.eup %751 }
 0x16f   : > { %531 = vst [vmem:[%s273_s25] sm:$0xff] %v509_v4  ;;  %v523_v6 = vsel %vm521_vm9, %v522_v3, %v520_v5  ;;  %v754_v8 = vpop.eup %753  ;;  %v511_v9 = vmul.f32 %v752_v7, %v500_v59 }
 0x170   : > { %533 = vst [vmem:[%s273_s25 + $0x10] sm:$0xff] %v523_v6  ;;  %v525_v15 = vmul.f32 %v754_v8, %v502_v60 }
 0x171   : > { %v513_v16 = vsel %vm512_vm10, %v500_v59, %v511_v9 }
 0x172   : > { %v516_v18 = vsel %vm514_vm11, %v515_v14, %v513_v16  ;;  %v527_v19 = vsel %vm526_vm12, %v502_v60, %v525_v15 }
 0x173   : > { %532 = vst [vmem:[%s273_s25 + $0x8] sm:$0xff] %v516_v18  ;;  %v530_v20 = vsel %vm528_vm13, %v529_v17, %v527_v19 }
 0x174   : > { %534 = vst [vmem:[%s273_s25 + $0x18] sm:$0xff] %v530_v20 }
 0x175 PF: > { %s13_s14 = sadd.s32 1, %s777_s14   ;;  %s996_s12 = smov %s773_s13 }
 0x176   : > { %p10_p5 = scmp.ge.s32.totalorder %s13_s14, 6   ;;  %s997_s13 = smov %s999_s15 }
 0x178   :  { %12 = sbr.rel (!%p10_p5) target bundleno = 2 (0x2), region = 65 }

</bundles_post_ra>
